<compile_context>
chip_gen: v7x
topology: tpu7x:2x2x1
jax: 0.10.0
libtpu: 0.0.40
codegen_flags: <defaults>
</compile_context>

<pallas_src>
import jax
import jax.numpy as jnp
from jax.experimental import pallas as pl
from jax.experimental.pallas import tpu as pltpu

LANES = 128
MAX_ROW_TILE = 2048   # (2048,128) f32 block = 1 MiB; pred+gt+mask ~2.25 MiB/buf


def _make_kernel(row_tile, rows, apply_row_mask):
    """Kernel closed over static tiling parameters."""

    def kernel(pred_ref, gt_ref, mask_ref, sum_ref, cnt_ref):
        s = pl.program_id(0)

        @pl.when(s == 0)
        def _():
            sum_ref[...] = jnp.zeros_like(sum_ref)
            cnt_ref[...] = jnp.zeros_like(cnt_ref)

        # keep = True where the element participates in the loss (mask == False).
        keep = jnp.logical_not(mask_ref[...])

        if apply_row_mask:
            # Last grid step reads a partially out-of-bounds block (unspecified
            # contents); drop any row past the true row count.
            row_ids = jax.lax.broadcasted_iota(jnp.int32, (row_tile, LANES), 0)
            valid = (s * row_tile + row_ids) < rows
            keep = jnp.logical_and(keep, valid)

        diff = pred_ref[...].astype(jnp.float32) - gt_ref[...].astype(jnp.float32)
        d2 = jnp.where(keep, diff * diff, 0.0)     # select, not mul: no NaN leak
        keep_f = keep.astype(jnp.float32)

        # Fold the (row_tile, 128) tile onto the (8, 128) vreg-shaped resident
        # accumulators with pure elementwise VPU adds (tile-aligned split, no
        # cross-lane XLU reduce per step).
        g = row_tile // 8
        sum_ref[...] += jnp.sum(d2.reshape(g, 8, LANES), axis=0)
        cnt_ref[...] += jnp.sum(keep_f.reshape(g, 8, LANES), axis=0)

    return kernel


def masked_mse_loss(pred, gt, mask):
    """pred, gt: float arrays (any shape); mask: bool, same shape (True = drop).

    Returns scalar f32 = mean((pred[~mask] - gt[~mask])**2).
    (NaN if nothing is kept — same as nn.MSELoss on an empty selection.)
    """
    if not jnp.issubdtype(pred.dtype, jnp.floating):
        pred = pred.astype(jnp.float32)
    if not jnp.issubdtype(gt.dtype, jnp.floating):
        gt = gt.astype(jnp.float32)
    mask = mask.astype(jnp.bool_)   # no-op for bool input; stays 1 byte/elem

    pred = pred.reshape(-1)
    gt = gt.reshape(-1)
    mask = mask.reshape(-1)

    n = pred.shape[0]
    rows_exact = pl.cdiv(n, LANES)

    if rows_exact >= MAX_ROW_TILE:
        # Big input: full-size row tiles, ragged tail handled in-kernel.
        row_tile = MAX_ROW_TILE
        rows = rows_exact
    else:
        # Small input: one full block, rounded to 32 rows for 1-byte mask tiling.
        row_tile = max(32, ((rows_exact + 31) // 32) * 32)
        rows = row_tile

    target_n = rows * LANES
    pad = target_n - n
    if pad:
        # Only hit for small inputs or when n % 128 != 0; large lane-aligned
        # inputs take the zero-copy reshape path with no extra HBM traffic.
        # TODO(synk): large inputs with n % 128 != 0 still pay one pad copy.
        pred = jnp.pad(pred, (0, pad))
        gt = jnp.pad(gt, (0, pad))
        mask = jnp.pad(mask, (0, pad), constant_values=True)  # padded -> dropped

    pred2 = pred.reshape(rows, LANES)
    gt2 = gt.reshape(rows, LANES)
    mask2 = mask.reshape(rows, LANES)

    steps = pl.cdiv(rows, row_tile)
    apply_row_mask = (rows % row_tile) != 0

    in_map = lambda s: (s, 0)
    out_map = lambda s: (0, 0)
    tile = pl.BlockSpec((row_tile, LANES), in_map)

    sums, cnts = pl.pallas_call(
        _make_kernel(row_tile, rows, apply_row_mask),
        out_shape=(
            jax.ShapeDtypeStruct((8, LANES), jnp.float32),
            jax.ShapeDtypeStruct((8, LANES), jnp.float32),
        ),
        grid_spec=pltpu.PrefetchScalarGridSpec(
            num_scalar_prefetch=0,
            grid=(steps,),
            in_specs=[tile, tile, tile],
            out_specs=[
                pl.BlockSpec((8, LANES), out_map),   # resident sum slab
                pl.BlockSpec((8, LANES), out_map),   # resident count slab
            ],
        ),
        compiler_params=pltpu.CompilerParams(
            dimension_semantics=("arbitrary",),
        ),
    )(pred2, gt2, mask2)

    # Tiny final cross-lane reduction + divide in plain JAX.
    return jnp.sum(sums) / jnp.sum(cnts)


if __name__ == "__main__":
    key = jax.random.PRNGKey(0)
    k1, k2, k3 = jax.random.split(key, 3)

    # NCHW inputs, small shapes
    shape = (2, 4, 16, 16)
    pred = jax.random.normal(k1, shape, dtype=jnp.float32)
    gt = jax.random.normal(k2, shape, dtype=jnp.float32)
    mask = jax.random.bernoulli(k3, p=0.3, shape=shape)  # True = masked out

    loss = masked_mse_loss(pred, gt, mask)
    jax.block_until_ready(loss)

    # Pure-JAX reference check
    keep = ~mask
    ref = jnp.sum(jnp.where(keep, (pred - gt) ** 2, 0.0)) / jnp.sum(
        keep.astype(jnp.float32)
    )
    assert jnp.allclose(loss, ref, rtol=1e-5, atol=1e-5), (loss, ref)

    print("KERNEL_OK")
</pallas_src>

<mosaic_0001>
module attributes {stable_mosaic.version = 11 : i64} {
  func.func @kernel(%arg0: i32, %arg1: memref<32x128xf32, #tpu.memory_space<vmem>>, %arg2: memref<32x128xf32, #tpu.memory_space<vmem>>, %arg3: memref<32x128xi32, #tpu.memory_space<vmem>>, %arg4: memref<8x128xf32, #tpu.memory_space<vmem>>, %arg5: memref<8x128xf32, #tpu.memory_space<vmem>>) attributes {dimension_semantics = [#tpu.dimension_semantics<arbitrary>], iteration_bounds = array<i64: 1>, scalar_prefetch = 0 : i64, scratch_operands = 0 : i64, tpu.core_type = #tpu.core_type<tc>, window_params = [{transform_indices = @transform_0, window_bounds = array<i64: 32, 128>}, {transform_indices = @transform_1, window_bounds = array<i64: 32, 128>}, {transform_indices = @transform_2, window_bounds = array<i64: 32, 128>}, {pipeline_mode = #tpu.pipeline_mode<synchronous>, transform_indices = @transform_3, window_bounds = array<i64: 8, 128>}, {pipeline_mode = #tpu.pipeline_mode<synchronous>, transform_indices = @transform_4, window_bounds = array<i64: 8, 128>}]} {
    %c0_i32 = arith.constant 0 : i32
    %0 = arith.cmpi eq, %arg0, %c0_i32 : i32
    %1 = arith.extui %0 : i1 to i32
    %c0_i32_0 = arith.constant 0 : i32
    %2 = arith.cmpi ne, %1, %c0_i32_0 : i32
    scf.if %2 {
      %cst_18 = arith.constant 0.000000e+00 : f32
      %24 = vector.broadcast %cst_18 : f32 to vector<8x128xf32>
      %c0_19 = arith.constant 0 : index
      %c0_20 = arith.constant 0 : index
      %25 = vector.load %arg4[%c0_19, %c0_20] : memref<8x128xf32, #tpu.memory_space<vmem>>, vector<8x128xf32>
      tpu.vector_store %arg4[%c0_19, %c0_20], %24 {strides = array<i32>} : memref<8x128xf32, #tpu.memory_space<vmem>>, vector<8x128xf32>,
      %cst_21 = arith.constant 0.000000e+00 : f32
      %26 = vector.broadcast %cst_21 : f32 to vector<8x128xf32>
      %c0_22 = arith.constant 0 : index
      %c0_23 = arith.constant 0 : index
      %27 = vector.load %arg5[%c0_22, %c0_23] : memref<8x128xf32, #tpu.memory_space<vmem>>, vector<8x128xf32>
      tpu.vector_store %arg5[%c0_22, %c0_23], %26 {strides = array<i32>} : memref<8x128xf32, #tpu.memory_space<vmem>>, vector<8x128xf32>,
    } else {
    }
    %c0 = arith.constant 0 : index
    %c0_1 = arith.constant 0 : index
    %3 = vector.load %arg3[%c0, %c0_1] : memref<32x128xi32, #tpu.memory_space<vmem>>, vector<32x128xi32>
    %cst = arith.constant dense<0> : vector<32x128xi32>
    %4 = arith.cmpi ne, %3, %cst : vector<32x128xi32>
    %cst_2 = arith.constant dense<true> : vector<32x128xi1>
    %5 = arith.xori %4, %cst_2 : vector<32x128xi1>
    %c0_3 = arith.constant 0 : index
    %c0_4 = arith.constant 0 : index
    %6 = vector.load %arg1[%c0_3, %c0_4] : memref<32x128xf32, #tpu.memory_space<vmem>>, vector<32x128xf32>
    %c0_5 = arith.constant 0 : index
    %c0_6 = arith.constant 0 : index
    %7 = vector.load %arg2[%c0_5, %c0_6] : memref<32x128xf32, #tpu.memory_space<vmem>>, vector<32x128xf32>
    %8 = arith.subf %6, %7 : vector<32x128xf32>
    %9 = arith.mulf %8, %8 : vector<32x128xf32>
    %cst_7 = arith.constant 0.000000e+00 : f32
    %10 = vector.broadcast %cst_7 : f32 to vector<32x128xf32>
    %11 = arith.select %5, %9, %10 : vector<32x128xi1>, vector<32x128xf32>
    %12 = arith.extui %5 : vector<32x128xi1> to vector<32x128xi32>
    %13 = arith.sitofp %12 : vector<32x128xi32> to vector<32x128xf32>
    %c0_8 = arith.constant 0 : index
    %c0_9 = arith.constant 0 : index
    %14 = vector.load %arg4[%c0_8, %c0_9] : memref<8x128xf32, #tpu.memory_space<vmem>>, vector<8x128xf32>
    %15 = vector.shape_cast %11 : vector<32x128xf32> to vector<4x8x128xf32>
    %cst_10 = arith.constant dense<0.000000e+00> : vector<8x128xf32>
    %16 = vector.multi_reduction <add>, %15, %cst_10 [0] : vector<4x8x128xf32> to vector<8x128xf32>
    %17 = arith.addf %14, %16 : vector<8x128xf32>
    %c0_11 = arith.constant 0 : index
    %c0_12 = arith.constant 0 : index
    %18 = vector.load %arg4[%c0_11, %c0_12] : memref<8x128xf32, #tpu.memory_space<vmem>>, vector<8x128xf32>
    tpu.vector_store %arg4[%c0_11, %c0_12], %17 {strides = array<i32>} : memref<8x128xf32, #tpu.memory_space<vmem>>, vector<8x128xf32>,
    %c0_13 = arith.constant 0 : index
    %c0_14 = arith.constant 0 : index
    %19 = vector.load %arg5[%c0_13, %c0_14] : memref<8x128xf32, #tpu.memory_space<vmem>>, vector<8x128xf32>
    %20 = vector.shape_cast %13 : vector<32x128xf32> to vector<4x8x128xf32>
    %cst_15 = arith.constant dense<0.000000e+00> : vector<8x128xf32>
    %21 = vector.multi_reduction <add>, %20, %cst_15 [0] : vector<4x8x128xf32> to vector<8x128xf32>
    %22 = arith.addf %19, %21 : vector<8x128xf32>
    %c0_16 = arith.constant 0 : index
    %c0_17 = arith.constant 0 : index
    %23 = vector.load %arg5[%c0_16, %c0_17] : memref<8x128xf32, #tpu.memory_space<vmem>>, vector<8x128xf32>
    tpu.vector_store %arg5[%c0_16, %c0_17], %22 {strides = array<i32>} : memref<8x128xf32, #tpu.memory_space<vmem>>, vector<8x128xf32>,
    return
  }
  func.func @transform_0(%arg0: i32) -> (i32, i32) {
    %c0_i32 = arith.constant 0 : i32
    %c0_i32_0 = arith.constant 0 : i32
    return %arg0, %c0_i32 : i32, i32
  }
  func.func @transform_1(%arg0: i32) -> (i32, i32) {
    %c0_i32 = arith.constant 0 : i32
    %c0_i32_0 = arith.constant 0 : i32
    return %arg0, %c0_i32 : i32, i32
  }
  func.func @transform_2(%arg0: i32) -> (i32, i32) {
    %c0_i32 = arith.constant 0 : i32
    %c0_i32_0 = arith.constant 0 : i32
    return %arg0, %c0_i32 : i32, i32
  }
  func.func @transform_3(%arg0: i32) -> (i32, i32) {
    %c0_i32 = arith.constant 0 : i32
    %c0_i32_0 = arith.constant 0 : i32
    %c0_i32_1 = arith.constant 0 : i32
    return %c0_i32, %c0_i32_0 : i32, i32
  }
  func.func @transform_4(%arg0: i32) -> (i32, i32) {
    %c0_i32 = arith.constant 0 : i32
    %c0_i32_0 = arith.constant 0 : i32
    %c0_i32_1 = arith.constant 0 : i32
    return %c0_i32, %c0_i32_0 : i32, i32
  }
}

</mosaic_0001>

<bundles_post_ra>
// kernel: tpu_custom_call.1
= control target key start
LH: loop header
LB: loop body
LE: loop exit
PB: predicated region body
PF: predicated region fallthrough
CT: control target
= control target key end

     0   :  { %10 = vsyncpa [#allocation3], 0  ;;  %s331_s0 = inlined_call_operand.vmem [shape: f32[32,128], index: 0, kind: input, shape index: {}]   ;;  %s332_s1 = inlined_call_operand.hbm [shape: f32[32,128], index: 1, kind: input, shape index: {}]   ;;  %s333_s2 = inlined_call_operand.vmem [shape: s32[32,128], index: 2, kind: input, shape index: {}]   ;;  %s334_s3 = inlined_call_operand.hbm [shape: f32[8,128], index: 3, kind: output, shape index: {0}]   ;;  %s335_s4 = inlined_call_operand.hbm [shape: f32[8,128], index: 4, kind: output, shape index: {1}]  }
   0x1   :  { %11 = vsyncpa [#allocation4], 0 }
   0x2   :  { %12 = vsyncpa [#allocation7], 0  ;;  %s202_s15 = smov [#allocation2]   ;;  %s130_s19 = scalar_lea.hbm %s332_s1, 512 }
   0x3   :  { %s20_s16 = sshll.u32 %s202_s15, 4  ;;  %p131_p0 = scmp.ne.s32.totalorder %s332_s1, %s130_s19  ;;  %s21_s16 = int_to_ptr.vmem [resolvable:$true] %s20_s16 }
   0x4   :  { %p134_p1 = scmp.lt.u32.totalorder %s130_s19, %s332_s1 }
   0x6   :  { %p136_p2 = pnand %p134_p1, %p131_p0 }
   0x8   :  { %139 = shalt.err (!%p136_p2)
}
   0x9   :  { %s140_s24 = scalar_lea.vmem %s21_s16, 512  ;;  %p145_p4 = scmp.lt.s32.totalorder %s21_s16, %s21_s16 }
   0xa   :  { %p141_p3 = scmp.ne.s32.totalorder %s21_s16, %s140_s24  ;;  %p146_p5 = scmp.lt.s32.totalorder %s140_s24, %s140_s24 }
   0xc   :  { %p147_p6 = por %p146_p5, %p145_p4 }
   0xe   :  { %p148_p7 = pnand %p147_p6, %p141_p3 }
  0x10   :  { %151 = shalt.err (!%p148_p7)
}
  0x11   :  { %s203_s25 = smov 128   ;;  %s204_s26 = smov 8  }
  0x12   :  { %26 = dma.hbm_to_vmem [thread:$0]  %s332_s1, 512, %s21_s16, [#allocation3], %s203_s25, %s203_s25, %s204_s26  }
  0x13   :  { %196 = dma.done.wait [#allocation3], 512  }
  0x14   :  { %197 = vsyncadd [#allocation3], 4294966784  ;;  %v38_v0 = vld [vmem:[%s333_s2] sm:$0xff]  ;;  %v39_v1 = vld [vmem:[%s333_s2 + $0x8] sm:$0xff]  ;;  %vm205_vm4 = vmmov 1   ;;  %v206_v12 = vmov 0.0  }
  0x15   :  { %v40_v2 = vld [vmem:[%s333_s2 + $0x10] sm:$0xff]  ;;  %v41_v3 = vld [vmem:[%s333_s2 + $0x18] sm:$0xff]  ;;  %vm42_vm0 = vcmp.ne.s32.totalorder %v38_v0, 0  ;;  %vm43_vm1 = vcmp.ne.s32.totalorder %v39_v1, 0  ;;  %v50_v4 = vld [vmem:[%s331_s0] sm:$0xff]  ;;  %s208_s18 = smov [#allocation5]  }
  0x16   :  { %vm44_vm2 = vcmp.ne.s32.totalorder %v40_v2, 0  ;;  %v51_v5 = vld [vmem:[%s331_s0 + $0x8] sm:$0xff]  ;;  %vm45_vm3 = vcmp.ne.s32.totalorder %v41_v3, 0  ;;  %vm265_vm5 = vmxor %vm42_vm0, %vm205_vm4  ;;  %v52_v7 = vld [vmem:[%s331_s0 + $0x10] sm:$0xff]  ;;  %s96_s19 = sshll.u32 %s208_s18, 4  ;;  %s97_s19 = int_to_ptr.vmem [resolvable:$true] %s96_s19 }
  0x17   :  { %v53_v8 = vld [vmem:[%s331_s0 + $0x18] sm:$0xff]  ;;  %vm276_vm6 = vmxor %vm43_vm1, %vm205_vm4  ;;  %v54_v10 = vld [vmem:[#allocation2] sm:$0xff]  ;;  %v119_v13 = vsel %vm265_vm5, 1.0, %v206_v12  ;;  %s207_s0 = smov [#allocation6]  }
  0x18   :  { %v55_v11 = vld [vmem:[#allocation2 + $0x8] sm:$0xff]  ;;  %vm283_vm7 = vmxor %vm44_vm2, %vm205_vm4  ;;  %v56_v15 = vld [vmem:[#allocation2 + $0x10] sm:$0xff]  ;;  %v58_v17 = vsub.f32 %v50_v4, %v54_v10  ;;  %v120_v19 = vsel %vm276_vm6, 1.0, %v206_v12  ;;  %s106_s17 = sshll.u32 %s207_s0, 4  ;;  %s107_s17 = int_to_ptr.vmem [resolvable:$true] %s106_s17 }
  0x19   :  { %v57_v16 = vld [vmem:[#allocation2 + $0x18] sm:$0xff]  ;;  %v59_v18 = vsub.f32 %v51_v5, %v55_v11  ;;  %vm291_vm8 = vmxor %vm45_vm3, %vm205_vm4  ;;  %v60_v21 = vsub.f32 %v52_v7, %v56_v15  ;;  %v121_v23 = vsel %vm283_vm7, 1.0, %v206_v12  ;;  %v85_v24 = vadd.f32 %v120_v19, %v119_v13  ;;  %s152_s20 = scalar_lea.vmem %s107_s17, 128  ;;  %p157_p9 = scmp.lt.s32.totalorder %s107_s17, %s107_s17 }
  0x1a   :  { %v61_v22 = vsub.f32 %v53_v8, %v57_v16  ;;  %v62_v25 = vmul.f32 %v58_v17, %v58_v17  ;;  %v122_v27 = vsel %vm291_vm8, 1.0, %v206_v12  ;;  %p153_p8 = scmp.ne.s32.totalorder %s107_s17, %s152_s20  ;;  %p158_p10 = scmp.lt.s32.totalorder %s152_s20, %s152_s20 }
  0x1b   :  { %v63_v26 = vmul.f32 %v59_v18, %v59_v18  ;;  %v64_v28 = vmul.f32 %v60_v21, %v60_v21  ;;  %v86_v30 = vadd.f32 %v121_v23, %v85_v24 }
  0x1c   :  { %v65_v29 = vmul.f32 %v61_v22, %v61_v22  ;;  %v66_v31 = vsel %vm265_vm5, %v62_v25, 0.0  ;;  %p159_p11 = por %p158_p10, %p157_p9 }
  0x1d   :  { %v67_v32 = vsel %vm276_vm6, %v63_v26, 0.0  ;;  %v68_v33 = vsel %vm283_vm7, %v64_v28, 0.0  ;;  %v87_v35 = vadd.f32 %v122_v27, %v86_v30 }
  0x1e   :  { %v79_v34 = vadd.f32 %v67_v32, %v66_v31  ;;  %v69_v36 = vsel %vm291_vm8, %v65_v29, 0.0  ;;  %p160_p12 = pnand %p159_p11, %p153_p8 }
  0x1f   :  { %89 = vst [vmem:[#allocation6] sm:$0xff] %v87_v35 }
  0x20   :  { %v80_v37 = vadd.f32 %v79_v34, %v68_v33 }
  0x22   :  { %v81_v38 = vadd.f32 %v80_v37, %v69_v36 }
  0x23   :  { %163 = shalt.err (!%p160_p12)
}
  0x24   :  { %s164_s23 = scalar_lea.hbm %s335_s4, 128 }
  0x25   :  { %p165_p13 = scmp.ne.s32.totalorder %s335_s4, %s164_s23  ;;  %p168_p0 = scmp.lt.u32.totalorder %s164_s23, %s335_s4 }
  0x27   :  { %p170_p1 = pnand %p168_p0, %p165_p13 }
  0x29   :  { %173 = shalt.err (!%p170_p1)
}
  0x2a   :  { %109 = dma.vmem_to_hbm [thread:$0]  %s107_s17, 128, %s335_s4, [#allocation7]   ;;  %83 = vst [vmem:[#allocation5] sm:$0xff] %v81_v38 }
  0x2b   :  { %s174_s30 = scalar_lea.vmem %s97_s19, 128  ;;  %p179_p3 = scmp.lt.s32.totalorder %s97_s19, %s97_s19 }
  0x2c   :  { %p175_p2 = scmp.ne.s32.totalorder %s97_s19, %s174_s30  ;;  %p180_p4 = scmp.lt.s32.totalorder %s174_s30, %s174_s30 }
  0x2e   :  { %p181_p5 = por %p180_p4, %p179_p3 }
  0x30   :  { %p182_p6 = pnand %p181_p5, %p175_p2 }
  0x32   :  { %185 = shalt.err (!%p182_p6)
}
  0x33   :  { %s186_s7 = scalar_lea.hbm %s334_s3, 128 }
  0x34   :  { %p187_p7 = scmp.ne.s32.totalorder %s334_s3, %s186_s7  ;;  %p190_p8 = scmp.lt.u32.totalorder %s186_s7, %s334_s3 }
  0x36   :  { %p192_p9 = pnand %p190_p8, %p187_p7 }
  0x38   :  { %195 = shalt.err (!%p192_p9)
}
  0x39   :  { %99 = dma.vmem_to_hbm [thread:$0]  %s97_s19, 128, %s334_s3, [#allocation4]  }
  0x3a   :  { %198 = dma.done.wait [#allocation4], 128  }
  0x3b   :  { %199 = vsyncadd [#allocation4], 4294967168 }
  0x3c   :  { %200 = dma.done.wait [#allocation7], 128  }
  0x3d   :  { %201 = vsyncadd [#allocation7], 4294967168 }
  0x3e   :  { %116 = vsyncpa [#allocation3], 1 }
  0x3f   :  { %117 = vsyncpa [#allocation4], 1 }
  0x40   :  { %118 = vsyncpa [#allocation7], 1 }

</bundles_post_ra>
